<compile_context>
chip_gen: v6e
topology: v6e:2x2x1
jax: 0.10.0
libtpu: 0.0.40
codegen_flags: <defaults>
</compile_context>

<pallas_src>
import math
import functools

import jax
import jax.numpy as jnp
from jax import lax
from jax.experimental import pallas as pl
from jax.experimental.pallas import tpu as pltpu


def _attn_kernel(*refs, heads, attn_ch, scale_sq):
    """One grid step = all heads for one (batch, q-tile).

    refs is either (qkv_ref, o_ref)               -- whole sequence in one block
                or (q_rows_ref, kv_full_ref, o_ref) -- q tiled, K/V full sequence
    qkv blocks are packed (1, rows, heads*3*attn_ch); the output block is the
    lane-dense (1, tq, heads*attn_ch) slab.
    """
    o_ref = refs[-1]
    q_ref = refs[0]
    kv_ref = refs[1] if len(refs) == 3 else refs[0]

    for h in range(heads):  # static unroll; heads is small (2-16)
        base = 3 * attn_ch * h
        q = q_ref[0, :, base:base + attn_ch]                     # (tq, d)
        k = kv_ref[0, :, base + attn_ch:base + 2 * attn_ch]      # (S, d)
        v = kv_ref[0, :, base + 2 * attn_ch:base + 3 * attn_ch]  # (S, d)

        # logits[t, s] = sum_c q[t, c] * k[s, c]; contraction on last dims
        # (no k.T relayout), f32 accumulation, scale folded into one multiply.
        w = lax.dot_general(
            q, k, (((1,), (1,)), ((), ())),
            preferred_element_type=jnp.float32,
        )
        w = w * scale_sq

        # softmax over s in float32 (matches the torch reference).
        m = jnp.max(w, axis=-1, keepdims=True)
        e = jnp.exp(w - m)
        denom = jnp.sum(e, axis=-1, keepdims=True)
        p = e * pl.reciprocal(denom, approx=True)

        # out[t, c] = sum_s p[t, s] * v[s, c]; probs cast back to input dtype
        # (torch: weight.to(qkv.dtype)) so bf16 inputs stay bf16 into the MXU.
        o = jnp.dot(p.astype(v.dtype), v, preferred_element_type=jnp.float32)
        o_ref[0, :, h * attn_ch:(h + 1) * attn_ch] = o.astype(o_ref.dtype)


def _pick_q_tile(n_ctx, max_rows=512):
    """Largest q tile (<= max_rows, multiple of 16, dividing n_ctx).

    512 rows keeps double-buffered blocks + (tq, n_ctx) f32 logits comfortably
    inside v7x's 64 MiB VMEM for point_e-sized widths / sequence lengths.
    """
    if n_ctx <= max_rows:
        return n_ctx
    for tq in (512, 256, 128, 64, 32, 16):
        if n_ctx % tq == 0:
            return tq
    return n_ctx  # fallback: single block covering the whole sequence


def qkv_multihead_attention(qkv, heads):
    """qkv: (bs, n_ctx, width) with width = heads * 3 * attn_ch."""
    bs, n_ctx, width = qkv.shape
    assert width % (3 * heads) == 0
    attn_ch = width // heads // 3
    scale = 1.0 / math.sqrt(math.sqrt(attn_ch))
    scale_sq = scale * scale                 # (q*s)·(k*s) == s^2 * (q·k)
    out_width = heads * attn_ch

    tq = _pick_q_tile(n_ctx)
    nq = n_ctx // tq

    kernel = functools.partial(
        _attn_kernel, heads=heads, attn_ch=attn_ch, scale_sq=scale_sq)
    out_shape = jax.ShapeDtypeStruct((bs, n_ctx, out_width), qkv.dtype)

    if nq == 1:
        # Whole sequence fits in one block: read packed qkv exactly once.
        grid = (bs,)
        in_specs = [pl.BlockSpec((1, n_ctx, width), lambda b: (b, 0, 0))]
        out_specs = pl.BlockSpec((1, n_ctx, out_width), lambda b: (b, 0, 0))
        operands = (qkv,)
        dims = ("parallel",)
    else:
        # q tiled along the sequence; K/V block spans the full sequence.
        grid = (bs, nq)
        in_specs = [
            pl.BlockSpec((1, tq, width), lambda b, qi: (b, qi, 0)),
            pl.BlockSpec((1, n_ctx, width), lambda b, qi: (b, 0, 0)),
        ]
        out_specs = pl.BlockSpec((1, tq, out_width), lambda b, qi: (b, qi, 0))
        operands = (qkv, qkv)
        dims = ("parallel", "parallel")

    return pl.pallas_call(
        kernel,
        out_shape=out_shape,
        grid_spec=pltpu.PrefetchScalarGridSpec(
            num_scalar_prefetch=0,
            grid=grid,
            in_specs=in_specs,
            out_specs=out_specs,
        ),
        compiler_params=pltpu.CompilerParams(dimension_semantics=dims),
    )(*operands)


def _reference(qkv, heads):
    bs, n_ctx, width = qkv.shape
    attn_ch = width // heads // 3
    scale = 1.0 / math.sqrt(math.sqrt(attn_ch))
    qkv4 = qkv.reshape(bs, n_ctx, heads, -1)
    q, k, v = jnp.split(qkv4, 3, axis=-1)
    w = jnp.einsum("bthc,bshc->bhts", q * scale, k * scale)
    w = jax.nn.softmax(w.astype(jnp.float32), axis=-1).astype(qkv.dtype)
    return jnp.einsum("bhts,bshc->bthc", w, v).reshape(bs, n_ctx, -1)


if __name__ == "__main__":
    # Small shapes consistent with the module: heads=2, attn_ch=32 -> width=192.
    bs, n_ctx, heads, attn_ch = 2, 8, 2, 32
    width = heads * 3 * attn_ch

    key = jax.random.PRNGKey(0)
    qkv = jax.random.normal(key, (bs, n_ctx, width), dtype=jnp.float32)

    out = jax.block_until_ready(qkv_multihead_attention(qkv, heads))

    ref = _reference(qkv, heads)
    assert out.shape == (bs, n_ctx, heads * attn_ch)
    # approx=True reciprocal in the softmax gives ~1e-3-level relative error.
    assert jnp.allclose(out, ref, atol=5e-3, rtol=5e-3), "mismatch vs reference"

    print("KERNEL_OK")
</pallas_src>

<mosaic_0001>
module attributes {stable_mosaic.version = 11 : i64} {
  func.func @_attn_kernel(%arg0: i32, %arg1: memref<1x8x192xf32, #tpu.memory_space<vmem>>, %arg2: memref<1x8x64xf32, #tpu.memory_space<vmem>>) attributes {dimension_semantics = [#tpu.dimension_semantics<parallel>], iteration_bounds = array<i64: 2>, scalar_prefetch = 0 : i64, scratch_operands = 0 : i64, tpu.core_type = #tpu.core_type<tc>, window_params = [{transform_indices = @transform_0, window_bounds = array<i64: 1, 8, 192>}, {transform_indices = @transform_1, window_bounds = array<i64: 1, 8, 64>}]} {
    %c0 = arith.constant 0 : index
    %c0_0 = arith.constant 0 : index
    %c0_1 = arith.constant 0 : index
    %0 = vector.load %arg1[%c0, %c0_0, %c0_1] : memref<1x8x192xf32, #tpu.memory_space<vmem>>, vector<1x8x32xf32>
    %1 = vector.shape_cast %0 : vector<1x8x32xf32> to vector<8x32xf32>
    %c0_2 = arith.constant 0 : index
    %c0_3 = arith.constant 0 : index
    %c32 = arith.constant 32 : index
    %2 = vector.load %arg1[%c0_2, %c0_3, %c32] : memref<1x8x192xf32, #tpu.memory_space<vmem>>, vector<1x8x32xf32>
    %3 = vector.shape_cast %2 : vector<1x8x32xf32> to vector<8x32xf32>
    %c0_4 = arith.constant 0 : index
    %c0_5 = arith.constant 0 : index
    %c64 = arith.constant 64 : index
    %4 = vector.load %arg1[%c0_4, %c0_5, %c64] : memref<1x8x192xf32, #tpu.memory_space<vmem>>, vector<1x8x32xf32>
    %5 = vector.shape_cast %4 : vector<1x8x32xf32> to vector<8x32xf32>
    %cst = arith.constant dense<0.000000e+00> : vector<8x8xf32>
    %6 = tpu.matmul %1, %3, %cst {dimension_numbers = #tpu.dot_dimension_numbers<[1], [1], [0], [0], [0, 0, 1, 0], [], []>} : vector<8x32xf32>, vector<8x32xf32>, vector<8x8xf32> -> vector<8x8xf32>
    %cst_6 = arith.constant 0.176776692 : f32
    %7 = vector.broadcast %cst_6 : f32 to vector<8x8xf32>
    %8 = arith.mulf %6, %7 : vector<8x8xf32>
    %cst_7 = arith.constant dense<0xFF800000> : vector<8xf32>
    %9 = vector.multi_reduction <maximumf>, %8, %cst_7 [1] : vector<8x8xf32> to vector<8xf32>
    %10 = vector.shape_cast %9 : vector<8xf32> to vector<8x1xf32>
    %11 = vector.broadcast %10 : vector<8x1xf32> to vector<8x8xf32>
    %12 = arith.subf %8, %11 : vector<8x8xf32>
    %13 = math.exp %12 : vector<8x8xf32>
    %cst_8 = arith.constant dense<0.000000e+00> : vector<8xf32>
    %14 = vector.multi_reduction <add>, %13, %cst_8 [1] : vector<8x8xf32> to vector<8xf32>
    %15 = vector.shape_cast %14 : vector<8xf32> to vector<8x1xf32>
    %16 = tpu.reciprocal %15 {approx = true} : vector<8x1xf32> -> vector<8x1xf32>
    %17 = vector.broadcast %16 : vector<8x1xf32> to vector<8x8xf32>
    %18 = arith.mulf %13, %17 : vector<8x8xf32>
    %cst_9 = arith.constant dense<0.000000e+00> : vector<8x32xf32>
    %19 = tpu.matmul %18, %5, %cst_9 {dimension_numbers = #tpu.dot_dimension_numbers<[1], [0], [0], [1], [0, 0, 1, 1], [], []>} : vector<8x8xf32>, vector<8x32xf32>, vector<8x32xf32> -> vector<8x32xf32>
    %c0_10 = arith.constant 0 : index
    %c0_11 = arith.constant 0 : index
    %c0_12 = arith.constant 0 : index
    %20 = vector.load %arg2[%c0_10, %c0_11, %c0_12] : memref<1x8x64xf32, #tpu.memory_space<vmem>>, vector<1x8x32xf32>
    %21 = vector.shape_cast %20 : vector<1x8x32xf32> to vector<8x32xf32>
    %22 = vector.shape_cast %19 : vector<8x32xf32> to vector<1x8x32xf32>
    tpu.vector_store %arg2[%c0_10, %c0_11, %c0_12], %22 {strides = array<i32>} : memref<1x8x64xf32, #tpu.memory_space<vmem>>, vector<1x8x32xf32>,
    %c0_13 = arith.constant 0 : index
    %c0_14 = arith.constant 0 : index
    %c96 = arith.constant 96 : index
    %23 = vector.load %arg1[%c0_13, %c0_14, %c96] : memref<1x8x192xf32, #tpu.memory_space<vmem>>, vector<1x8x32xf32>
    %24 = vector.shape_cast %23 : vector<1x8x32xf32> to vector<8x32xf32>
    %c0_15 = arith.constant 0 : index
    %c0_16 = arith.constant 0 : index
    %c128 = arith.constant 128 : index
    %25 = vector.load %arg1[%c0_15, %c0_16, %c128] : memref<1x8x192xf32, #tpu.memory_space<vmem>>, vector<1x8x32xf32>
    %26 = vector.shape_cast %25 : vector<1x8x32xf32> to vector<8x32xf32>
    %c0_17 = arith.constant 0 : index
    %c0_18 = arith.constant 0 : index
    %c160 = arith.constant 160 : index
    %27 = vector.load %arg1[%c0_17, %c0_18, %c160] : memref<1x8x192xf32, #tpu.memory_space<vmem>>, vector<1x8x32xf32>
    %28 = vector.shape_cast %27 : vector<1x8x32xf32> to vector<8x32xf32>
    %cst_19 = arith.constant dense<0.000000e+00> : vector<8x8xf32>
    %29 = tpu.matmul %24, %26, %cst_19 {dimension_numbers = #tpu.dot_dimension_numbers<[1], [1], [0], [0], [0, 0, 1, 0], [], []>} : vector<8x32xf32>, vector<8x32xf32>, vector<8x8xf32> -> vector<8x8xf32>
    %cst_20 = arith.constant 0.176776692 : f32
    %30 = vector.broadcast %cst_20 : f32 to vector<8x8xf32>
    %31 = arith.mulf %29, %30 : vector<8x8xf32>
    %cst_21 = arith.constant dense<0xFF800000> : vector<8xf32>
    %32 = vector.multi_reduction <maximumf>, %31, %cst_21 [1] : vector<8x8xf32> to vector<8xf32>
    %33 = vector.shape_cast %32 : vector<8xf32> to vector<8x1xf32>
    %34 = vector.broadcast %33 : vector<8x1xf32> to vector<8x8xf32>
    %35 = arith.subf %31, %34 : vector<8x8xf32>
    %36 = math.exp %35 : vector<8x8xf32>
    %cst_22 = arith.constant dense<0.000000e+00> : vector<8xf32>
    %37 = vector.multi_reduction <add>, %36, %cst_22 [1] : vector<8x8xf32> to vector<8xf32>
    %38 = vector.shape_cast %37 : vector<8xf32> to vector<8x1xf32>
    %39 = tpu.reciprocal %38 {approx = true} : vector<8x1xf32> -> vector<8x1xf32>
    %40 = vector.broadcast %39 : vector<8x1xf32> to vector<8x8xf32>
    %41 = arith.mulf %36, %40 : vector<8x8xf32>
    %cst_23 = arith.constant dense<0.000000e+00> : vector<8x32xf32>
    %42 = tpu.matmul %41, %28, %cst_23 {dimension_numbers = #tpu.dot_dimension_numbers<[1], [0], [0], [1], [0, 0, 1, 1], [], []>} : vector<8x8xf32>, vector<8x32xf32>, vector<8x32xf32> -> vector<8x32xf32>
    %c0_24 = arith.constant 0 : index
    %c0_25 = arith.constant 0 : index
    %c32_26 = arith.constant 32 : index
    %43 = vector.load %arg2[%c0_24, %c0_25, %c32_26] : memref<1x8x64xf32, #tpu.memory_space<vmem>>, vector<1x8x32xf32>
    %44 = vector.shape_cast %43 : vector<1x8x32xf32> to vector<8x32xf32>
    %45 = vector.shape_cast %42 : vector<8x32xf32> to vector<1x8x32xf32>
    tpu.vector_store %arg2[%c0_24, %c0_25, %c32_26], %45 {strides = array<i32>} : memref<1x8x64xf32, #tpu.memory_space<vmem>>, vector<1x8x32xf32>,
    return
  }
  func.func @transform_0(%arg0: i32) -> (i32, i32, i32) {
    %c0_i32 = arith.constant 0 : i32
    %c0_i32_0 = arith.constant 0 : i32
    %c0_i32_1 = arith.constant 0 : i32
    return %arg0, %c0_i32, %c0_i32_0 : i32, i32, i32
  }
  func.func @transform_1(%arg0: i32) -> (i32, i32, i32) {
    %c0_i32 = arith.constant 0 : i32
    %c0_i32_0 = arith.constant 0 : i32
    %c0_i32_1 = arith.constant 0 : i32
    return %arg0, %c0_i32, %c0_i32_0 : i32, i32, i32
  }
}

</mosaic_0001>

<bundles_post_ra>
// kernel: tpu_custom_call.1
= control target key start
LH: loop header
LB: loop body
LE: loop exit
PB: predicated region body
PF: predicated region fallthrough
CT: control target
= control target key end

     0   :  { %6 = vsyncpa [#allocation3], 0  ;;  %s954_s0 = inlined_call_operand.hbm [shape: f32[2,8,192], index: 0, kind: input, shape index: {}]   ;;  %s955_s1 = inlined_call_operand.hbm [shape: f32[2,8,64], index: 1, kind: output, shape index: {}]  }
   0x1   :  { %8 = vsyncpa [#allocation3 + $0x1], 0 }
   0x2   :  { %9 = vsyncpa [#allocation4], 0 }
   0x3   :  { %11 = vsyncpa [#allocation4 + $0x1], 0  ;;  %s778_s6 = smov 0   ;;  %s780_s7 = smov 0  }
   0x4   :  { %s782_s8 = smov 0   ;;  %s784_s9 = smov 0  }
   0x5 LB: > { %s799_s10 = sadd.s32 4294967295, %s759_s9   ;;  %s560_s11 = sadd.s32 4294967294, %s759_s9   ;;  %s759_s9 = sphi %s784_s9, %s972_s9   ;;  %s755_s8 = sphi %s782_s8, %s971_s8   ;;  %s751_s7 = sphi %s780_s7, %s970_s7   ;;  %s747_s6 = sphi %s778_s6, %s969_s6  }
   0x6   : > { %s803_s12 = sadd.s32 1, %s759_s9   ;;  %s24_s13 = sadd.s32 1, %s755_s8 }
   0x7   : > { %s21_s14 = ssub.s32 %s759_s9, %s803_s12  ;;  %p31_p0 = scmp.ne.s32.totalorder %s755_s8, %s751_s7 }
   0x8   : > { %p22_p1 = scmp.eq.s32.totalorder %s21_s14, 0  ;;  %p32_p2 = scmp.eq.s32.totalorder %s759_s9, 0 }
   0x9   : > { %p37_p3 = scmp.ne.s32.totalorder %s751_s7, %s747_s6  ;;  %p38_p4 = scmp.eq.s32.totalorder %s799_s10, 0 }
   0xa   : > { %s815_s15 = scalar_select %p22_p1, %s755_s8, %s24_s13  }
   0xb   : > { %p817_p5 = por %p32_p2, %p31_p0  ;;  %p821_p6 = por %p38_p4, %p37_p3 }
   0xc   : > { %p61_p7 = scmp.eq.s32.totalorder %s799_s10, 1  ;;  %p67_p8 = scmp.eq.s32.totalorder %s560_s11, 1 }
   0xd   : > { %s959_s17 = scalar_select %p821_p6, 1, 0 }
   0xe   : > { %p620_p10 = scmp.lt.s32.totalorder %s759_s9, 2  ;;  %p828_p11 = por %p61_p7, %p31_p0 }
   0xf   : > { %p832_p12 = por %p67_p8, %p37_p3  ;;  %s87_s20 = sand.u32 1, %s755_s8  }
  0x10   : > { %s960_s18 = scalar_select %p828_p11, 1, 0 }
  0x11   : > { %s961_s19 = scalar_select %p832_p12, 1, 0 }
  0x12   : > { %s579_s21 = sshll.u32 %s759_s9, 8  ;;  %s563_s22 = sshll.u32 %s87_s20, 4 }
  0x13   : > { %s841_s25 = scalar_lea.hbm %s954_s0, %s579_s21  ;;  %s91_s26 = scalar_lea.vmem [#allocation2], %s563_s22 }
  0x14   : > { %s99_s27 = sshll.u32 %s91_s26, 4  ;;  %p845_p13 = pnand %p620_p10, %p817_p5  ;;  %s849_s27 = int_to_ptr.vmem [resolvable:$true] %s99_s27 }
  0x15   : > { %s88_s29 = scalar_lea.sflag [#allocation3], %s87_s20  ;;  %s667_s30 = scalar_lea.hbm %s841_s25, 256 }
  0x16   : > { %p668_p2 = scmp.ne.s32.totalorder %s841_s25, %s667_s30  ;;  %p669_p3 = pneg %p845_p13 }
  0x17   : > { %s672_s4 = scalar_lea.hbm %s954_s0, 512  ;;  %p673_p5 = scmp.lt.s32.totalorder %s841_s25, %s954_s0 }
  0x18   : > { %p670_p4 = pnand %p669_p3, %p668_p2  ;;  %p674_p8 = scmp.lt.s32.totalorder %s672_s4, %s667_s30 }
  0x1a   : > { %p671_p7 = pneg %p670_p4  ;;  %p675_p10 = por %p674_p8, %p673_p5 }
  0x1c   : > { %p676_p9 = pnand %p675_p10, %p671_p7 }
  0x1e   : > { %679 = shalt.err (!%p676_p9)
}
  0x1f   : > { %s680_s13 = scalar_lea.vmem %s849_s27, 256  ;;  %s761_s14 = smov [#allocation2]  }
  0x20   : > { %p681_p0 = scmp.ne.s32.totalorder %s849_s27, %s680_s13  ;;  %s685_s16 = sshll.u32 %s761_s14, 4  ;;  %s686_s16 = int_to_ptr.vmem [resolvable:$false] %s685_s16 }
  0x21   : > { %s687_s20 = scalar_lea.vmem %s686_s16, 512  ;;  %p688_p4 = scmp.lt.s32.totalorder %s849_s27, %s686_s16 }
  0x22   : > { %p683_p1 = pnand %p681_p0, %p669_p3  ;;  %p689_p12 = scmp.lt.s32.totalorder %s687_s20, %s680_s13 }
  0x24   : > { %p684_p2 = pneg %p683_p1  ;;  %p690_p11 = por %p689_p12, %p688_p4 }
  0x26   : > { %p691_p6 = pnand %p690_p11, %p684_p2 }
  0x28   : > { %694 = shalt.err (!%p691_p6)
}
  0x29   : > { %615 = dma.hbm_to_vmem [thread:$0]  (!%p845_p13), %s841_s25, 256, %s849_s27, %s88_s29  }
  0x2a   : > { %p963_p9 = scmp.lt.s32.totalorder %s759_s9, 3  ;;  %p964_p7 = scmp.ge.s32.totalorder %s759_s9, 1 }
  0x2c   : > { %p105_p0 = pnand %p964_p7, %p963_p9 }
  0x2d   : > { %s876_s21 = sand.u32 (!%p105_p0), 1, %s751_s7   ;;  %p965_p6 = scmp.ne.s32.totalorder (!%p105_p0), %s959_s17, 0 }
  0x2e   : > { %108 = sbr.rel (%p105_p0) target bundleno = 1512 (0x5e8), region = 24  ;;  %s567_s22 = sshll.u32 (!%p105_p0), %s876_s21, 4 }
  0x2f   : > { %s111_s23 = scalar_lea.sflag (!%p105_p0), [#allocation3], %s876_s21  ;;  %s880_s24 = scalar_lea.vmem (!%p105_p0), [#allocation2], %s567_s22 }
  0x33   : > { %738 = dma.done.wait (%p965_p6), %s111_s23, 256  }
  0x34   : > { %740 = vsyncadd (%p965_p6), %s111_s23, 4294967040  ;;  %v762_v0 = vmov 0.0   ;;  %vm763_vm0 = vmmov 0   ;;  %v133_v1 = vld [vmem:[%s880_s24] sm:$0xff]  ;;  %s764_s25 = smov 96   ;;  %vm137_vm1 = vcmask 261120  }
  0x35   : > { %588 = vmatprep.subr.mxu0 %v762_v0  ;;  %590 = vmatprep.mubr.msk.f32.mxu0 %vm763_vm0, %v762_v0  ;;  %s765_s17 = smov 64   ;;  %vm213_vm2 = vcmask 64512   ;;  %s766_s26 = smov 32   ;;  %v303_v16 = vld [vmem:[%s880_s24 + $0x8] sm:$0xff]  ;;  %vm474_vm3 = vcmask 523520  }
  0x36   : > { %593 = vmatprep.subr.mxu1 %v762_v0  ;;  %595 = vmatprep.mubr.msk.f32.mxu1 %vm763_vm0, %v762_v0  ;;  %s568_s27 = sshll.u32 %s876_s21, 3  ;;  %s576_s29 = sshll.u32 %s799_s10, 7 }
  0x37   : > { %135 = vrot.lane.b32.xlu0 %v133_v1, %s764_s25  ;;  %225 = vrot.lane.b32.xlu1 %v133_v1, %s765_s17  ;;  %s902_s28 = scalar_lea.vmem [#allocation5], %s568_s27  ;;  %s916_s4 = scalar_lea.hbm %s955_s1, %s576_s29 }
  0x38   : > { %s490_s30 = sshll.u32 %s902_s28, 4  ;;  %s477_s5 = scalar_lea.sflag [#allocation4], %s876_s21  ;;  %s491_s30 = int_to_ptr.vmem [resolvable:$true] %s490_s30 }
  0x39   : > { %s695_s11 = scalar_lea.vmem %s491_s30, 128  ;;  %p966_p12 = scmp.ne.s32.totalorder %s960_s18, 0 }
  0x3a   : > { %p696_p11 = scmp.ne.s32.totalorder %s491_s30, %s695_s11  ;;  %s767_s13 = smov [#allocation5]  }
  0x3b   : > { %s699_s14 = sshll.u32 %s767_s13, 4  ;;  %s700_s14 = int_to_ptr.vmem [resolvable:$false] %s699_s14 }
  0x3c   : > { %p697_p13 = pnand %p696_p11, %p966_p12  ;;  %s701_s10 = scalar_lea.vmem %s700_s14, 256 }
  0x3d   : > { %p702_p3 = scmp.lt.s32.totalorder %s491_s30, %s700_s14  ;;  %p703_p5 = scmp.lt.s32.totalorder %s701_s10, %s695_s11 }
  0x3e   : > { %p698_p1 = pneg %p697_p13 }
  0x3f   : > { %p704_p8 = por %p703_p5, %p702_p3 }
  0x41   : > { %p705_p10 = pnand %p704_p8, %p698_p1 }
  0xa9   : > { %v136_v2 = vpop.permute.xlu0 %135  ;;  %v226_v7 = vpop.permute.xlu1 %225 }
  0xaa   : > { %589 = vmatpush3.xpose.msk.msra.mxu0 %vm137_vm1, %v136_v2  ;;  %594 = vmatpush3.msra.mxu1 %v226_v7 }
  0xab   : > { %603 = vmatprep.subr.mxu0 %v762_v0  ;;  %598 = vmatprep.subr.mxu1 %v762_v0 }
  0xad   : > { %591 = vmatmul.mubr.msk.f32.vlgmr.msra.gmra.mxu0 %vm137_vm1, %v133_v1 }
  0xae   : > { %605 = vmatprep.mubr.msk.f32.mxu0 %vm763_vm0, %v762_v0 }
 0x16d   : > { %v208_v3 = vpop.f32.mrf.mxu0 }
 0x16e   : > { %v212_v4 = vmul.f32 0.17677669, %v208_v3 }
 0x16f   : > { %v592_v5 = vpop.f32.mrf.mxu0 }
 0x170   : > { %v214_v6 = vsel %vm213_vm2, %v212_v4, -inf }
 0x171   : > { %215 = vmax.xlane.f32.xlu0 %v214_v6 }
 0x1fa   : > { %v216_v8 = vpop.xlane.xlu0 %215 }
 0x1fb   : > { %v217_v9 = vsub.f32 %v212_v4, %v216_v8 }
 0x1fd   : > { %v218_v10 = vmul.f32 1.442695, %v217_v9 }
 0x1ff   : > { %659 = vpow2.f32 %v218_v10 }
 0x20c   : > { %v660_v11 = vpop.eup %659 }
 0x20d   : > { %v220_v12 = vsel %vm213_vm2, %v660_v11, 0.0 }
 0x20e   : > { %221 = vadd.xlane.f32.xlu1 %v220_v12 }
 0x21f   : > { %305 = vrot.lane.b32.xlu1 %v133_v1, %s766_s26 }
 0x297   : > { %v222_v13 = vpop.xlane.xlu1 %221 }
 0x298   : > { %661 = vrcp.f32 %v222_v13 }
 0x29b   : > { %v306_v17 = vpop.permute.xlu1 %305 }
 0x2a5   : > { %v662_v14 = vpop.eup %661 }
 0x2a6   : > { %v224_v15 = vmul.f32 %v662_v14, %v660_v11 }
 0x2a8   : > { %596 = vmatmul.mubr.msk.f32.vlgmr.msra.gmra.mxu1 %vm213_vm2, %v224_v15 }
 0x2a9   : > { %599 = vmatpush3.xpose.msk.msra.mxu1 %vm137_vm1, %v303_v16  ;;  %600 = vmatprep.mubr.msk.f32.mxu1 %vm763_vm0, %v762_v0 }
 0x2ac   : > { %601 = vmatmul.mubr.msk.f32.vlgmr.msra.gmra.mxu1 %vm137_vm1, %v306_v17 }
 0x368   : > { %v297_v18 = vpop.f32.mrf.mxu1 }
 0x369   : > { %301 = vst.msk [vmem:[%s902_s28] sm:$0xff] %vm137_vm1, %v297_v18 }
 0x36a   : > { %v597_v19 = vpop.f32.mrf.mxu1 }
 0x36c   : > { %v378_v20 = vpop.f32.mrf.mxu1 }
 0x36d   : > { %v382_v21 = vmul.f32 0.17677669, %v378_v20 }
 0x36e   : > { %v602_v22 = vpop.f32.mrf.mxu1 }
 0x36f   : > { %v383_v23 = vsel %vm213_vm2, %v382_v21, -inf }
 0x370   : > { %384 = vmax.xlane.f32.xlu1 %v383_v23 }
 0x3f9   : > { %v385_v24 = vpop.xlane.xlu1 %384 }
 0x3fa   : > { %v386_v25 = vsub.f32 %v382_v21, %v385_v24 }
 0x3fc   : > { %v387_v26 = vmul.f32 1.442695, %v386_v25 }
 0x3fe   : > { %663 = vpow2.f32 %v387_v26 }
 0x40b   : > { %v664_v27 = vpop.eup %663 }
 0x40c   : > { %v389_v28 = vsel %vm213_vm2, %v664_v27, 0.0 }
 0x40d   : > { %390 = vadd.xlane.f32.xlu0 %v389_v28 }
 0x423   : > { %394 = vrot.lane.b32.xlu0 %v303_v16, %s764_s25 }
 0x496   : > { %v391_v29 = vpop.xlane.xlu0 %390 }
 0x497   : > { %665 = vrcp.f32 %v391_v29 }
 0x49a   : > { %v395_v30 = vpop.permute.xlu0 %394 }
 0x49b   : > { %604 = vmatpush3.msra.mxu0 %v395_v30 }
 0x4a4   : > { %v666_v31 = vpop.eup %665 }
 0x4a5   : > { %v393_v32 = vmul.f32 %v666_v31, %v664_v27 }
 0x4a7   : > { %606 = vmatmul.mubr.msk.f32.vlgmr.msra.gmra.mxu0 %vm213_vm2, %v393_v32 }
 0x567   : > { %v466_v33 = vpop.f32.mrf.mxu0 }
 0x568   : > { %471 = vrot.lane.b32.xlu0 %v466_v33, %s766_s26 }
 0x569   : > { %v607_v34 = vpop.f32.mrf.mxu0 }
 0x5da   : > { %v472_v35 = vpop.permute.xlu0 %471 }
 0x5db   : > { %475 = vst.msk [vmem:[%s902_s28] sm:$0xff] %vm474_vm3, %v472_v35 }
 0x5dc   : > { %708 = shalt.err (!%p705_p10)
}
 0x5dd   : > { %s709_s16 = scalar_lea.hbm %s916_s4, 128  ;;  %s713_s22 = scalar_lea.hbm %s955_s1, 256 }
 0x5de   : > { %p710_p2 = scmp.ne.s32.totalorder %s916_s4, %s709_s16  ;;  %p714_p7 = scmp.lt.s32.totalorder %s916_s4, %s955_s1 }
 0x5df   : > { %p715_p0 = scmp.lt.s32.totalorder %s713_s22, %s709_s16 }
 0x5e0   : > { %p711_p4 = pnand %p710_p2, %p966_p12 }
 0x5e1   : > { %p716_p6 = por %p715_p0, %p714_p7 }
 0x5e2   : > { %p712_p9 = pneg %p711_p4 }
 0x5e4   : > { %p717_p11 = pnand %p716_p6, %p712_p9 }
 0x5e6   : > { %720 = shalt.err (!%p717_p11)
}
 0x5e7   : > { %610 = dma.vmem_to_hbm [thread:$0]  (%p966_p12), %s491_s30, 128, %s916_s4, %s477_s5  }
 0x5e8 PF: > { %s502_s25 = sand.u32 1, %s747_s6   ;;  %p967_p13 = scmp.ne.s32.totalorder %s961_s19, 0 }
 0x5e9   : > { %p968_p1 = scmp.ge.s32.totalorder %s759_s9, 2  ;;  %s503_s17 = scalar_lea.sflag [#allocation4], %s502_s25 }
 0x5eb   : > { %p617_p3 = pnand %p968_p1, %p967_p13 }
 0x5ed   : > { %p618_p5 = pneg %p617_p3 }
 0x5ef   : > { %742 = dma.done.wait (%p618_p5), %s503_s17, 128  }
 0x5f0   : > { %744 = vsyncadd (%p618_p5), %s503_s17, 4294967168  ;;  %p14_p8 = scmp.ge.s32.totalorder %s803_s12, 4   ;;  %s969_s6 = smov %s751_s7 }
 0x5f1   : > { %s970_s7 = smov %s755_s8  ;;  %s971_s8 = smov %s815_s15 }
 0x5f2   : > { %s972_s9 = smov %s803_s12  ;;  %16 = sbr.rel (!%p14_p8) target bundleno = 5 (0x5), region = 69 }
 0x5f7   :  { %508 = vsyncpa [#allocation3], 1 }
 0x5f8   :  { %510 = vsyncpa [#allocation3 + $0x1], 1 }
 0x5f9   :  { %511 = vsyncpa [#allocation4], 1 }
 0x5fa   :  { %513 = vsyncpa [#allocation4 + $0x1], 1 }

</bundles_post_ra>
